<compile_context>
chip_gen: v6e
topology: v6e:2x2x1
jax: 0.10.0
libtpu: 0.0.40
codegen_flags: <defaults>
</compile_context>

<pallas_src>
import math

import jax
import jax.numpy as jnp
from jax import lax
from jax.experimental import pallas as pl
from jax.experimental.pallas import tpu as pltpu


def _gelu_exact_f32(x):
    # nn.GELU() default: exact (erf-based) GELU, evaluated in f32 on the VPU/EUP.
    return 0.5 * x * (1.0 + lax.erf(x * jnp.float32(1.0 / math.sqrt(2.0))))


def _round_up(n, m):
    return ((n + m - 1) // m) * m


def _sublane_multiple(dtype):
    # Native sublane packing: 8 rows for 4-byte, 16 for 2-byte, 32 for 1-byte.
    itemsize = max(jnp.dtype(dtype).itemsize, 1)
    return max(8, 32 // itemsize)


_VMEM_HEADROOM = 12 << 20          # leave room for Mosaic internal scratch


def _vmem_capacity_bytes():
    try:
        cap = int(pltpu.get_tpu_info().vmem_capacity_bytes)
        if cap > 0:
            return cap
    except Exception:
        pass
    return 64 << 20                # conservative fallback (v7x physical VMEM)


_BUFFERED_ONE_OK = None


def _buffered_one_supported():
    """One-time trace+compile probe for pipeline_mode=pl.Buffered(1)."""
    global _BUFFERED_ONE_OK
    if _BUFFERED_ONE_OK is None:
        ok = hasattr(pl, "Buffered")
        if ok:
            try:
                def _probe_kernel(a_ref, o_ref):
                    o_ref[...] = a_ref[...]

                probe = pl.pallas_call(
                    _probe_kernel,
                    out_shape=jax.ShapeDtypeStruct((8, 128), jnp.float32),
                    grid=(1,),
                    in_specs=[pl.BlockSpec((8, 128), lambda i: (0, 0),
                                           pipeline_mode=pl.Buffered(1))],
                    out_specs=pl.BlockSpec((8, 128), lambda i: (0, 0)),
                )
                arg = jax.ShapeDtypeStruct((8, 128), jnp.float32)
                jax.jit(probe).lower(arg).compile()
            except Exception:
                ok = False
        _BUFFERED_ONE_OK = ok
    return _BUFFERED_ONE_OK


def adapter_kernel(x_ref, win_ref, wout_ref, o_ref, h_ref):
    # x_ref:    (tm, H)   token row tile
    # win_ref:  (H, D)    full w_in^T (VMEM-resident across the whole grid)
    # wout_ref: (D, tn)   column tile of w_out^T (tn == D when fully resident)
    # o_ref:    (tm, tn)  output tile
    # h_ref:    (tm, D)   GELU(x @ w_in^T) in the activation dtype, computed
    #                     once per row tile (column axis must stay 'arbitrary')
    @pl.when(pl.program_id(1) == 0)
    def _():
        h = jnp.dot(x_ref[...], win_ref[...],
                    preferred_element_type=jnp.float32)
        h_ref[...] = _gelu_exact_f32(h).astype(h_ref.dtype)

    # Native-dtype matmul (bf16 in production) with f32 accumulation.
    out = jnp.dot(h_ref[...], wout_ref[...],
                  preferred_element_type=jnp.float32)
    o_ref[...] = out.astype(o_ref.dtype)


def prepare_adapter_weights(w_in, w_out):
    """Hoisted to weight-load time: transpose PyTorch-layout ([out, in]) weights.

    w_in: [D, H] -> w_in_t [H, D];  w_out: [D, D] -> w_out_t [D, D]
    """
    return jnp.transpose(w_in), jnp.transpose(w_out)


def _plan_tiles(S, H, D, x_dtype, w_dtype, tm, tn, single_buf, usable):
    sub = _sublane_multiple(x_dtype)
    x_it = jnp.dtype(x_dtype).itemsize
    w_it = jnp.dtype(w_dtype).itemsize
    o_it = x_it
    h_it = x_it
    win_buf = 1 if single_buf else 2

    def footprint(tm_, tn_):
        wout_buf = 1 if (tn_ == D and single_buf) else 2
        return (2 * tm_ * H * x_it            # x row tile (double-buffered)
                + win_buf * H * D * w_it      # resident w_in^T
                + wout_buf * D * tn_ * w_it   # w_out^T tile
                + 2 * tm_ * tn_ * o_it        # output tile (double-buffered)
                + tm_ * D * h_it)             # GELU scratch

    s_full = _round_up(max(S, sub), sub)

    # Column tile: keep w_out^T fully resident (fetched once) whenever it fits.
    if tn is None:
        probe_tm = min(256, s_full)
        if D % 128 != 0:
            tn = D
        else:
            for cand in range(D, 0, -128):
                if D % cand != 0:
                    continue
                tn = cand
                if footprint(probe_tm, cand) <= usable:
                    break
    assert D % tn == 0, f"column tile {tn} must divide D={D}"

    # Row tile.
    if tm is None:
        if tn == D:
            # w_out is never re-streamed -> favour >=2 row tiles on the
            # 'parallel' axis (v7x megacore) for short sequences.
            tm = min(256, s_full)
            if tm == s_full and S > sub:
                tm = _round_up(-(-S // 2), sub)
        else:
            # Column-tiled w_out^T is re-fetched once per row tile: make row
            # tiles as large as the VMEM budget allows.
            tm = min(512, s_full)
        while tm > sub and footprint(tm, tn) > usable:
            tm = _round_up(tm // 2, sub)
    tm = _round_up(tm, sub)

    return tm, tn, footprint(tm, tn)


def audio_language_adapter(x, w_in_t, w_out_t, *, tm=None, tn=None):
    """x: [S, H]; w_in_t: [H, D] (= w_in.T); w_out_t: [D, D] (= w_out.T)."""
    S, H = x.shape
    H2, D = w_in_t.shape
    assert H2 == H and w_out_t.shape == (D, D)

    single_buf = _buffered_one_supported()
    usable = _vmem_capacity_bytes() - _VMEM_HEADROOM
    tm, tn, vmem_need = _plan_tiles(S, H, D, x.dtype, w_in_t.dtype,
                                    tm, tn, single_buf, usable)

    # Arbitrary token counts: zero-pad to a row-tile multiple, slice back.
    S_pad = _round_up(max(S, tm), tm)
    x_p = jnp.pad(x, ((0, S_pad - S), (0, 0))) if S_pad != S else x

    grid = (S_pad // tm, D // tn)
    vmem_limit = int(min(max(vmem_need + (8 << 20), 32 << 20), usable))

    wout_resident = (tn == D)
    win_kwargs = {"pipeline_mode": pl.Buffered(1)} if single_buf else {}
    wout_kwargs = ({"pipeline_mode": pl.Buffered(1)}
                   if (single_buf and wout_resident) else {})

    x_item = jnp.dtype(x.dtype).itemsize
    w_item = jnp.dtype(w_in_t.dtype).itemsize
    cost = pl.CostEstimate(
        flops=2 * S_pad * D * (H + D),
        transcendentals=S_pad * D,
        bytes_accessed=((S_pad * H + S_pad * D) * x_item
                        + (H * D + D * D) * w_item),
    )

    out = pl.pallas_call(
        adapter_kernel,
        out_shape=jax.ShapeDtypeStruct((S_pad, D), x.dtype),
        grid_spec=pltpu.PrefetchScalarGridSpec(
            num_scalar_prefetch=0,
            grid=grid,
            in_specs=[
                pl.BlockSpec((tm, H), lambda i, j: (i, 0)),               # x tile
                pl.BlockSpec((H, D), lambda i, j: (0, 0), **win_kwargs),  # w_in^T
                pl.BlockSpec((D, tn), lambda i, j: (0, j), **wout_kwargs),  # w_out^T
            ],
            out_specs=pl.BlockSpec((tm, tn), lambda i, j: (i, j)),
            scratch_shapes=[pltpu.VMEM((tm, D), x.dtype)],
        ),
        compiler_params=pltpu.CompilerParams(
            dimension_semantics=("parallel", "arbitrary"),
            vmem_limit_bytes=vmem_limit,
        ),
        cost_estimate=cost,
    )(x_p, w_in_t, w_out_t)

    return out[:S] if S_pad != S else out


def adapter_ref(x, w_in_t, w_out_t):
    h = jnp.dot(x.astype(jnp.float32), w_in_t.astype(jnp.float32))
    h = 0.5 * h * (1.0 + lax.erf(h / jnp.sqrt(jnp.float32(2.0))))
    return jnp.dot(h, w_out_t.astype(jnp.float32))


if __name__ == "__main__":
    # Small shapes consistent with the module: 40 audio tokens (deliberately
    # NOT a tile multiple), hidden_size = 128, dim = 256.
    S, H, D = 40, 128, 256

    key = jax.random.PRNGKey(0)
    kx, kwin, kwout = jax.random.split(key, 3)

    x = jax.random.normal(kx, (S, H), dtype=jnp.float32)
    # Deterministic "nn.Linear"-style init, PyTorch layout [out_feat, in_feat].
    w_in = jax.random.uniform(kwin, (D, H), dtype=jnp.float32,
                              minval=-1.0 / math.sqrt(H),
                              maxval=1.0 / math.sqrt(H))
    w_out = jax.random.uniform(kwout, (D, D), dtype=jnp.float32,
                               minval=-1.0 / math.sqrt(D),
                               maxval=1.0 / math.sqrt(D))

    # Transpose once at "weight load" time (hoisted out of the call path).
    w_in_t, w_out_t = prepare_adapter_weights(w_in, w_out)
    ref = adapter_ref(x, w_in_t, w_out_t)

    # 1) Default (auto) tiling: resident w_out^T, >=2 row tiles, f32.
    out = jax.block_until_ready(audio_language_adapter(x, w_in_t, w_out_t))
    assert out.shape == (S, D)
    assert jnp.allclose(out, ref, atol=2e-3, rtol=2e-3), "f32 (auto) mismatch"

    # 2) Explicit small tiles: exercises row padding + column-tiled w_out^T
    #    (the pl.when h-scratch reuse path).
    out2 = jax.block_until_ready(
        audio_language_adapter(x, w_in_t, w_out_t, tm=16, tn=128))
    assert jnp.allclose(out2, ref, atol=2e-3, rtol=2e-3), "f32 (tiled) mismatch"

    # 3) Production dtype: bf16 activations/weights, bf16 GELU scratch,
    #    MXU-native bf16 matmuls with f32 accumulation.
    xb = x.astype(jnp.bfloat16)
    wtb_in = w_in_t.astype(jnp.bfloat16)
    wtb_out = w_out_t.astype(jnp.bfloat16)
    out_b = jax.block_until_ready(audio_language_adapter(xb, wtb_in, wtb_out))
    ref_b = adapter_ref(xb, wtb_in, wtb_out)
    assert jnp.allclose(out_b.astype(jnp.float32), ref_b,
                        atol=3e-2, rtol=3e-2), "bf16 mismatch"

    print("KERNEL_OK")
</pallas_src>

<mosaic_0001>
module attributes {stable_mosaic.version = 11 : i64} {
  func.func @adapter_kernel(%arg0: i32, %arg1: i32, %arg2: memref<24x128xf32, #tpu.memory_space<vmem>>, %arg3: memref<128x256xf32, #tpu.memory_space<vmem>>, %arg4: memref<256x256xf32, #tpu.memory_space<vmem>>, %arg5: memref<24x256xf32, #tpu.memory_space<vmem>>, %arg6: memref<24x256xf32, #tpu.memory_space<vmem>>) attributes {dimension_semantics = [#tpu.dimension_semantics<parallel>, #tpu.dimension_semantics<arbitrary>], iteration_bounds = array<i64: 2, 1>, scalar_prefetch = 0 : i64, scratch_operands = 1 : i64, tpu.core_type = #tpu.core_type<tc>, window_params = [{transform_indices = @transform_0, window_bounds = array<i64: 24, 128>}, {pipeline_mode = #tpu.pipeline_mode<synchronous>, transform_indices = @transform_1, window_bounds = array<i64: 128, 256>}, {transform_indices = @transform_2, window_bounds = array<i64: 256, 256>}, {transform_indices = @transform_3, window_bounds = array<i64: 24, 256>}]} {
    %c0_i32 = arith.constant 0 : i32
    %0 = arith.cmpi eq, %arg1, %c0_i32 : i32
    %1 = arith.extui %0 : i1 to i32
    %c0_i32_0 = arith.constant 0 : i32
    %2 = arith.cmpi ne, %1, %c0_i32_0 : i32
    scf.if %2 {
      %c0_6 = arith.constant 0 : index
      %c0_7 = arith.constant 0 : index
      %7 = vector.load %arg2[%c0_6, %c0_7] : memref<24x128xf32, #tpu.memory_space<vmem>>, vector<24x128xf32>
      %c0_8 = arith.constant 0 : index
      %c0_9 = arith.constant 0 : index
      %8 = vector.load %arg3[%c0_8, %c0_9] : memref<128x256xf32, #tpu.memory_space<vmem>>, vector<128x256xf32>
      %cst_10 = arith.constant dense<0.000000e+00> : vector<24x256xf32>
      %9 = tpu.matmul %7, %8, %cst_10 {dimension_numbers = #tpu.dot_dimension_numbers<[1], [0], [0], [1], [0, 0, 1, 1], [], []>} : vector<24x128xf32>, vector<128x256xf32>, vector<24x256xf32> -> vector<24x256xf32>
      %cst_11 = arith.constant 5.000000e-01 : f32
      %10 = vector.broadcast %cst_11 : f32 to vector<24x256xf32>
      %11 = arith.mulf %10, %9 : vector<24x256xf32>
      %cst_12 = arith.constant 0.707106769 : f32
      %12 = vector.broadcast %cst_12 : f32 to vector<24x256xf32>
      %13 = arith.mulf %9, %12 : vector<24x256xf32>
      %14 = math.erf %13 : vector<24x256xf32>
      %cst_13 = arith.constant 1.000000e+00 : f32
      %15 = vector.broadcast %cst_13 : f32 to vector<24x256xf32>
      %16 = arith.addf %15, %14 : vector<24x256xf32>
      %17 = arith.mulf %11, %16 : vector<24x256xf32>
      %c0_14 = arith.constant 0 : index
      %c0_15 = arith.constant 0 : index
      %18 = vector.load %arg6[%c0_14, %c0_15] : memref<24x256xf32, #tpu.memory_space<vmem>>, vector<24x256xf32>
      tpu.vector_store %arg6[%c0_14, %c0_15], %17 {strides = array<i32>} : memref<24x256xf32, #tpu.memory_space<vmem>>, vector<24x256xf32>,
    } else {
    }
    %c0 = arith.constant 0 : index
    %c0_1 = arith.constant 0 : index
    %3 = vector.load %arg6[%c0, %c0_1] : memref<24x256xf32, #tpu.memory_space<vmem>>, vector<24x256xf32>
    %c0_2 = arith.constant 0 : index
    %c0_3 = arith.constant 0 : index
    %4 = vector.load %arg4[%c0_2, %c0_3] : memref<256x256xf32, #tpu.memory_space<vmem>>, vector<256x256xf32>
    %cst = arith.constant dense<0.000000e+00> : vector<24x256xf32>
    %5 = tpu.matmul %3, %4, %cst {dimension_numbers = #tpu.dot_dimension_numbers<[1], [0], [0], [1], [0, 0, 1, 1], [], []>} : vector<24x256xf32>, vector<256x256xf32>, vector<24x256xf32> -> vector<24x256xf32>
    %c0_4 = arith.constant 0 : index
    %c0_5 = arith.constant 0 : index
    %6 = vector.load %arg5[%c0_4, %c0_5] : memref<24x256xf32, #tpu.memory_space<vmem>>, vector<24x256xf32>
    tpu.vector_store %arg5[%c0_4, %c0_5], %5 {strides = array<i32>} : memref<24x256xf32, #tpu.memory_space<vmem>>, vector<24x256xf32>,
    return
  }
  func.func @transform_0(%arg0: i32, %arg1: i32) -> (i32, i32) {
    %c0_i32 = arith.constant 0 : i32
    %c0_i32_0 = arith.constant 0 : i32
    return %arg0, %c0_i32 : i32, i32
  }
  func.func @transform_1(%arg0: i32, %arg1: i32) -> (i32, i32) {
    %c0_i32 = arith.constant 0 : i32
    %c0_i32_0 = arith.constant 0 : i32
    %c0_i32_1 = arith.constant 0 : i32
    return %c0_i32, %c0_i32_0 : i32, i32
  }
  func.func @transform_2(%arg0: i32, %arg1: i32) -> (i32, i32) {
    %c0_i32 = arith.constant 0 : i32
    %c0_i32_0 = arith.constant 0 : i32
    return %c0_i32, %arg1 : i32, i32
  }
  func.func @transform_3(%arg0: i32, %arg1: i32) -> (i32, i32) {
    %c0_i32 = arith.constant 0 : i32
    return %arg0, %arg1 : i32, i32
  }
}

</mosaic_0001>

<bundles_post_ra>
// kernel: tpu_custom_call.1
= control target key start
LH: loop header
LB: loop body
LE: loop exit
PB: predicated region body
PF: predicated region fallthrough
CT: control target
= control target key end

     0   :  { %8 = vsyncpa [#allocation4], 0  ;;  %s1198_s0 = inlined_call_operand.hbm [shape: f32[48,128], index: 0, kind: input, shape index: {}]   ;;  %s1199_s1 = inlined_call_operand.hbm [shape: f32[128,256], index: 1, kind: input, shape index: {}]   ;;  %s1200_s2 = inlined_call_operand.hbm [shape: f32[256,256], index: 2, kind: input, shape index: {}]   ;;  %s1201_s3 = inlined_call_operand.hbm [shape: f32[48,256], index: 3, kind: output, shape index: {}]  }
   0x1   :  { %10 = vsyncpa [#allocation4 + $0x1], 0 }
   0x2   :  { %11 = vsyncpa [#allocation7], 0 }
   0x3   :  { %12 = vsyncpa [#allocation5], 0 }
   0x4   :  { %14 = vsyncpa [#allocation5 + $0x1], 0  ;;  %s1003_s12 = smov 0   ;;  %s1005_s13 = smov 0  }
   0x5   :  { %s1007_s14 = smov 0   ;;  %s1009_s15 = smov 0  }
   0x6   :  { %s1011_s16 = smov 0   ;;  %s1013_s17 = smov 0  }
   0x7 LB: > { %s683_s18 = sadd.s32 4294967295, %s970_s17   ;;  %s684_s19 = sadd.s32 4294967294, %s970_s17   ;;  %s970_s17 = sphi %s1013_s17, %s20_s17   ;;  %s966_s16 = sphi %s1011_s16, %s1221_s16   ;;  %s962_s15 = sphi %s1009_s15, %s1220_s15   ;;  %s958_s14 = sphi %s1007_s14, %s1219_s14   ;;  %s954_s13 = sphi %s1005_s13, %s1218_s13   ;;  %s950_s12 = sphi %s1003_s12, %s1217_s12  }
   0x8   : > { %p52_p0 = scmp.ne.s32.totalorder %s954_s13, %s950_s12  ;;  %p1037_p1 = scmp.eq.s32.totalorder %s683_s18, 0 }
   0x9   : > { %p1041_p2 = scmp.eq.s32.totalorder %s683_s18, 1  ;;  %p131_p3 = scmp.eq.s32.totalorder %s684_s19, 1 }
   0xa   : > { %s1205_s20 = scalar_select %p1037_p1, 1, 0 }
   0xb   : > { %p1047_p4 = por %p1037_p1, %p52_p0  ;;  %p685_p5 = scmp.ge.s32.totalorder %s970_s17, 1 }
   0xc   : > { %p1052_p6 = por %p131_p3, %p52_p0  ;;  %p138_p7 = scmp.lt.s32.totalorder %s970_s17, 3 }
   0xd   : > { %s1207_s22 = scalar_select %p1047_p4, 1, 0 }
   0xe   : > { %s1208_s23 = scalar_select %p1052_p6, 1, 0 }
   0xf   : > { %p1057_p8 = pnand %p685_p5, %p138_p7  ;;  %s972_s25 = smov [#allocation6]  }
  0x10   : > { %s150_s26 = sshll.u32 %s972_s25, 4  ;;  %s973_s28 = smov [#allocation8]   ;;  %s151_s26 = int_to_ptr.vmem [resolvable:$true] %s150_s26 }
  0x11   : > { %p716_p9 = pneg %p1057_p8  ;;  %s166_s29 = sshll.u32 %s973_s28, 4  ;;  %s167_s29 = int_to_ptr.vmem [resolvable:$true] %s166_s29 }
  0x12   : > { %s817_s30 = scalar_lea.vmem %s151_s26, 4096  ;;  %p825_p5 = scmp.lt.s32.totalorder %s151_s26, %s151_s26 }
  0x13   : > { %p1066_p11 = pnand %p716_p9, %p1037_p1  ;;  %p818_p13 = scmp.ne.s32.totalorder %s151_s26, %s817_s30 }
  0x14   : > { %p826_p7 = scmp.lt.s32.totalorder %s817_s30, %s817_s30 }
  0x15   : > { %p808_p12 = pneg %p1066_p11 }
  0x16   : > { %p827_p10 = por %p826_p7, %p825_p5 }
  0x17   : > { %p820_p0 = pnand %p818_p13, %p808_p12 }
  0x19   : > { %p821_p3 = pneg %p820_p0 }
  0x1b   : > { %p828_p9 = pnand %p827_p10, %p821_p3 }
  0x1d   : > { %831 = shalt.err (!%p828_p9)
}
  0x1e   : > { %s974_s4 = smov 256   ;;  %s975_s5 = smov 16  }
  0x1f   : > { %719 = dma.hbm_to_vmem [thread:$0]  (!%p1066_p11), %s1199_s1, 4096, %s151_s26, [#allocation7], %s974_s4, %s974_s4, %s975_s5  }
  0x20   : > { %s843_s8 = scalar_lea.vmem %s167_s29, 8192  ;;  %p851_p1 = scmp.lt.s32.totalorder %s167_s29, %s167_s29 }
  0x21   : > { %p844_p6 = scmp.ne.s32.totalorder %s167_s29, %s843_s8  ;;  %p852_p4 = scmp.lt.s32.totalorder %s843_s8, %s843_s8 }
  0x23   : > { %p846_p13 = pnand %p844_p6, %p808_p12  ;;  %p853_p5 = por %p852_p4, %p851_p1 }
  0x25   : > { %p847_p0 = pneg %p846_p13 }
  0x27   : > { %p854_p10 = pnand %p853_p5, %p847_p0 }
  0x29   : > { %857 = shalt.err (!%p854_p10)
}
  0x2a   : > { %722 = dma.hbm_to_vmem [thread:$0]  (!%p1066_p11), %s1200_s2, 8192, %s167_s29, [#allocation7], %s974_s4, %s974_s4, %s975_s5  }
  0x2b   : > { %s32_s11 = sadd.s32 1, %s966_s16  ;;  %s39_s18 = sadd.s32 1, %s958_s14 }
  0x2c   : > { %p34_p1 = scmp.ge.s32.totalorder %s32_s11, 2  ;;  %p46_p4 = scmp.ne.s32.totalorder %s958_s14, %s954_s13 }
  0x2d   : > { %p47_p6 = scmp.eq.s32.totalorder %s970_s17, 0  ;;  %p733_p12 = scmp.lt.s32.totalorder %s970_s17, 2 }
  0x2e   : > { %s1223_s11 = smov (%p34_p1, %s32_s11), 0  ;;  %p1098_p7 = por %p1041_p2, %p46_p4 }
  0x2f   : > { %p48_p3 = por %p47_p6, %p46_p4  ;;  %s36_s25 = ssub.s32 %s966_s16, %s1223_s11 }
  0x30   : > { %s180_s26 = sand.u32 1, %s958_s14   ;;  %p37_p9 = scmp.eq.s32.totalorder %s36_s25, 0 }
  0x31   : > { %s701_s27 = smul.u32 24, %s180_s26  ;;  %p1105_p11 = pnand %p733_p12, %p48_p3 }
  0x32   : > { %s1110_s29 = scalar_select %p37_p9, %s958_s14, %s39_s18  }
  0x33   : > { %s697_s30 = smul.u32 384, %s966_s16  ;;  %s184_s4 = scalar_lea.vmem [#allocation3], %s701_s27 }
  0x34   : > { %s191_s5 = sshll.u32 %s184_s4, 4  ;;  %s181_s8 = scalar_lea.sflag [#allocation4], %s180_s26  ;;  %s192_s5 = int_to_ptr.vmem [resolvable:$true] %s191_s5 }
  0x35   : > { %s190_s7 = scalar_lea.hbm %s1198_s0, %s697_s30  ;;  %p860_p2 = pneg %p1105_p11 }
  0x36   : > { %s871_s9 = scalar_lea.vmem %s192_s5, 384  ;;  %s976_s10 = smov [#allocation3]  }
  0x37   : > { %p872_p13 = scmp.ne.s32.totalorder %s192_s5, %s871_s9  ;;  %s876_s25 = sshll.u32 %s976_s10, 4  ;;  %s877_s25 = int_to_ptr.vmem [resolvable:$false] %s876_s25 }
  0x38   : > { %s878_s18 = scalar_lea.vmem %s877_s25, 768  ;;  %p879_p10 = scmp.lt.s32.totalorder %s192_s5, %s877_s25 }
  0x39   : > { %p874_p0 = pnand %p872_p13, %p860_p2  ;;  %p880_p1 = scmp.lt.s32.totalorder %s878_s18, %s871_s9 }
  0x3b   : > { %p875_p5 = pneg %p874_p0  ;;  %p881_p4 = por %p880_p1, %p879_p10 }
  0x3d   : > { %p882_p6 = pnand %p881_p4, %p875_p5 }
  0x3f   : > { %885 = shalt.err (!%p882_p6)
}
  0x40   : > { %s977_s27 = smov 128   ;;  %s978_s30 = smov 8  }
  0x41   : > { %726 = dma.hbm_to_vmem [thread:$0]  (!%p1105_p11), %s190_s7, 384, %s192_s5, %s181_s8, %s977_s27, %s977_s27, %s978_s30  }
  0x42   : > { %203 = sbr.rel (%p1057_p8) target bundleno = 541 (0x21d), region = 32  ;;  %s1123_s26 = sand.u32 (!%p1057_p8), 1, %s954_s13  }
  0x43   : > { %s702_s4 = smul.u32 (!%p1057_p8), 24, %s1123_s26  ;;  %s206_s6 = scalar_lea.sflag (!%p1057_p8), [#allocation4], %s1123_s26 }
  0x44   : > { %p1213_p12 = scmp.ne.s32.totalorder (!%p1057_p8), %s1207_s22, 0 }
  0x45   : > { %s1127_s21 = scalar_lea.vmem (!%p1057_p8), [#allocation3], %s702_s4 }
  0x47   : > { %937 = dma.done.wait (%p1213_p12), %s206_s6, 384  }
  0x48   : > { %939 = vsyncadd (%p1213_p12), %s206_s6, 4294966912  ;;  %p1214_p3 = scmp.ne.s32.totalorder %s1205_s20, 0 }
  0x4a   : > { %941 = dma.done.wait (%p1214_p3), [#allocation7], 12288  }
  0x4b   : > { %943 = vsyncadd (%p1214_p3), [#allocation7], 4294955008  ;;  %v979_v0 = vmov 0.0   ;;  %v282_v1 = vld [vmem:[#allocation6 + $0xf8] sm:$0xff]  ;;  %v281_v2 = vld [vmem:[#allocation6 + $0xf0] sm:$0xff]  ;;  %s703_s20 = smul.u32 48, %s1123_s26 }
  0x4c   : > { %347 = vmatprep.mubr.f32.mxu0 %v979_v0  ;;  %v280_v3 = vld [vmem:[#allocation6 + $0xe8] sm:$0xff]  ;;  %283 = vmatprep.subr.mxu0 %v282_v1  ;;  %v279_v4 = vld [vmem:[#allocation6 + $0xe0] sm:$0xff]  ;;  %v278_v5 = vld [vmem:[#allocation6 + $0xd8] sm:$0xff]  ;;  %s700_s28 = smul.u32 768, %s962_s15  ;;  %s562_s9 = scalar_lea.sflag [#allocation5], %s1123_s26 }
  0x4d   : > { %284 = vmatpush1.msra.mxu0 %v281_v2  ;;  %v277_v6 = vld [vmem:[#allocation6 + $0xd0] sm:$0xff]  ;;  %v276_v7 = vld [vmem:[#allocation6 + $0xc8] sm:$0xff]  ;;  %v275_v8 = vld [vmem:[#allocation6 + $0xc0] sm:$0xff]  ;;  %s239_s22 = scalar_lea.vmem [#allocation9], %s703_s20  ;;  %s980_s15 = smov [#allocation9]  }
  0x4e   : > { %285 = vmatprep.subr.mxu0 %v280_v3  ;;  %v274_v9 = vld [vmem:[#allocation6 + $0xb8] sm:$0xff]  ;;  %v273_v10 = vld [vmem:[#allocation6 + $0xb0] sm:$0xff]  ;;  %v272_v11 = vld [vmem:[#allocation6 + $0xa8] sm:$0xff]  ;;  %s578_s24 = sshll.u32 %s239_s22, 4  ;;  %s1150_s8 = scalar_lea.hbm %s1201_s3, %s700_s28  ;;  %s1145_s24 = int_to_ptr.vmem [resolvable:$true] %s578_s24 }
  0x4f   : > { %286 = vmatpush1.msra.mxu0 %v279_v4  ;;  %v271_v12 = vld [vmem:[#allocation6 + $0xa0] sm:$0xff]  ;;  %v270_v13 = vld [vmem:[#allocation6 + $0x98] sm:$0xff]  ;;  %v269_v14 = vld [vmem:[#allocation6 + $0x90] sm:$0xff]  ;;  %s886_s10 = scalar_lea.vmem %s1145_s24, 768  ;;  %s890_s25 = sshll.u32 %s980_s15, 4  ;;  %s891_s25 = int_to_ptr.vmem [resolvable:$false] %s890_s25 }
  0x50   : > { %287 = vmatprep.subr.mxu0 %v278_v5  ;;  %v268_v15 = vld [vmem:[#allocation6 + $0x88] sm:$0xff]  ;;  %v439_v16 = vld [vmem:[#allocation8 + $0xf8] sm:$0xff]  ;;  %v438_v17 = vld [vmem:[#allocation8 + $0xf0] sm:$0xff]  ;;  %p887_p8 = scmp.ne.s32.totalorder %s1145_s24, %s886_s10  ;;  %s892_s18 = scalar_lea.vmem %s891_s25, 1536 }
  0x51   : > { %288 = vmatpush1.msra.mxu0 %v277_v6  ;;  %472 = vmatprep.subr.mxu1 %v439_v16  ;;  %v437_v18 = vld [vmem:[#allocation8 + $0xe8] sm:$0xff]  ;;  %v436_v19 = vld [vmem:[#allocation8 + $0xe0] sm:$0xff]  ;;  %v435_v21 = vld [vmem:[#allocation8 + $0xd8] sm:$0xff]  ;;  %p893_p2 = scmp.lt.s32.totalorder %s1145_s24, %s891_s25  ;;  %p894_p13 = scmp.lt.s32.totalorder %s892_s18, %s886_s10 }
  0x52   : > { %289 = vmatprep.subr.mxu0 %v276_v7  ;;  %v267_v20 = vld [vmem:[#allocation6 + $0x80] sm:$0xff]  ;;  %473 = vmatpush1.msra.mxu1 %v438_v17  ;;  %v266_v22 = vld [vmem:[#allocation6 + $0x78] sm:$0xff]  ;;  %v434_v23 = vld [vmem:[#allocation8 + $0xd0] sm:$0xff]  ;;  %p888_p9 = pnand %p887_p8, %p1098_p7 }
  0x53   : > { %290 = vmatpush1.msra.mxu0 %v275_v8  ;;  %474 = vmatprep.subr.mxu1 %v437_v18  ;;  %v265_v24 = vld [vmem:[#allocation6 + $0x70] sm:$0xff]  ;;  %v433_v25 = vld [vmem:[#allocation8 + $0xc8] sm:$0xff]  ;;  %v432_v27 = vld [vmem:[#allocation8 + $0xc0] sm:$0xff]  ;;  %p895_p0 = por %p894_p13, %p893_p2 }
  0x54   : > { %291 = vmatprep.subr.mxu0 %v274_v9  ;;  %475 = vmatpush1.msra.mxu1 %v436_v19  ;;  %v264_v26 = vld [vmem:[#allocation6 + $0x68] sm:$0xff]  ;;  %v263_v28 = vld [vmem:[#allocation6 + $0x60] sm:$0xff]  ;;  %v431_v29 = vld [vmem:[#allocation8 + $0xb8] sm:$0xff]  ;;  %p889_p11 = pneg %p888_p9 }
  0x55   : > { %292 = vmatpush1.msra.mxu0 %v273_v10  ;;  %476 = vmatprep.subr.mxu1 %v435_v21  ;;  %v262_v30 = vld [vmem:[#allocation6 + $0x58] sm:$0xff]  ;;  %v430_v31 = vld [vmem:[#allocation8 + $0xb0] sm:$0xff]  ;;  %v429_v33 = vld [vmem:[#allocation8 + $0xa8] sm:$0xff] }
  0x56   : > { %293 = vmatprep.subr.mxu0 %v272_v11  ;;  %477 = vmatpush1.msra.mxu1 %v434_v23  ;;  %v261_v32 = vld [vmem:[#allocation6 + $0x50] sm:$0xff]  ;;  %v260_v34 = vld [vmem:[#allocation6 + $0x48] sm:$0xff]  ;;  %v428_v35 = vld [vmem:[#allocation8 + $0xa0] sm:$0xff]  ;;  %p896_p5 = pnand %p895_p0, %p889_p11 }
  0x57   : > { %294 = vmatpush1.msra.mxu0 %v271_v12  ;;  %478 = vmatprep.subr.mxu1 %v433_v25  ;;  %v259_v36 = vld [vmem:[#allocation6 + $0x40] sm:$0xff]  ;;  %v427_v37 = vld [vmem:[#allocation8 + $0x98] sm:$0xff]  ;;  %v426_v39 = vld [vmem:[#allocation8 + $0x90] sm:$0xff] }
  0x58   : > { %295 = vmatprep.subr.mxu0 %v270_v13  ;;  %479 = vmatpush1.msra.mxu1 %v432_v27  ;;  %v258_v38 = vld [vmem:[#allocation6 + $0x38] sm:$0xff]  ;;  %v257_v40 = vld [vmem:[#allocation6 + $0x30] sm:$0xff]  ;;  %v425_v41 = vld [vmem:[#allocation8 + $0x88] sm:$0xff] }
  0x59   : > { %296 = vmatpush1.msra.mxu0 %v269_v14  ;;  %480 = vmatprep.subr.mxu1 %v431_v29  ;;  %v256_v42 = vld [vmem:[#allocation6 + $0x28] sm:$0xff]  ;;  %v424_v43 = vld [vmem:[#allocation8 + $0x80] sm:$0xff]  ;;  %v423_v45 = vld [vmem:[#allocation8 + $0x78] sm:$0xff] }
  0x5a   : > { %297 = vmatprep.subr.mxu0 %v268_v15  ;;  %481 = vmatpush1.msra.mxu1 %v430_v31  ;;  %v255_v44 = vld [vmem:[#allocation6 + $0x20] sm:$0xff]  ;;  %v254_v46 = vld [vmem:[#allocation6 + $0x18] sm:$0xff]  ;;  %v422_v47 = vld [vmem:[#allocation8 + $0x70] sm:$0xff] }
  0x5b   : > { %298 = vmatpush1.msra.mxu0 %v267_v20  ;;  %482 = vmatprep.subr.mxu1 %v429_v33  ;;  %v253_v48 = vld [vmem:[#allocation6 + $0x10] sm:$0xff]  ;;  %v421_v49 = vld [vmem:[#allocation8 + $0x68] sm:$0xff]  ;;  %v420_v51 = vld [vmem:[#allocation8 + $0x60] sm:$0xff] }
  0x5c   : > { %299 = vmatprep.subr.mxu0 %v266_v22  ;;  %483 = vmatpush1.msra.mxu1 %v428_v35  ;;  %v252_v50 = vld [vmem:[#allocation6 + $0x8] sm:$0xff]  ;;  %v251_v52 = vld [vmem:[#allocation6] sm:$0xff]  ;;  %v419_v53 = vld [vmem:[#allocation8 + $0x58] sm:$0xff] }
  0x5d   : > { %300 = vmatpush1.msra.mxu0 %v265_v24  ;;  %484 = vmatprep.subr.mxu1 %v427_v37  ;;  %v248_v54 = vld [vmem:[%s1127_s21] sm:$0xff]  ;;  %v416_v57 = vld [vmem:[#allocation8 + $0x40] sm:$0xff]  ;;  %v415_v58 = vld [vmem:[#allocation8 + $0x38] sm:$0xff] }
  0x5e   : > { %301 = vmatprep.subr.mxu0 %v264_v26  ;;  %485 = vmatpush1.msra.mxu1 %v426_v39  ;;  %v418_v55 = vld [vmem:[#allocation8 + $0x50] sm:$0xff]  ;;  %v417_v56 = vld [vmem:[#allocation8 + $0x48] sm:$0xff]  ;;  %v412_v62 = vld [vmem:[#allocation8 + $0x20] sm:$0xff] }
  0x5f   : > { %302 = vmatpush1.msra.mxu0 %v263_v28  ;;  %486 = vmatprep.subr.mxu1 %v425_v41  ;;  %v249_v59 = vld [vmem:[%s1127_s21 + $0x8] sm:$0xff]  ;;  %v413_v61 = vld [vmem:[#allocation8 + $0x28] sm:$0xff]  ;;  %v250_v1 = vld [vmem:[%s1127_s21 + $0x10] sm:$0xff] }
  0x60   : > { %303 = vmatprep.subr.mxu0 %v262_v30  ;;  %487 = vmatpush1.msra.mxu1 %v424_v43  ;;  %v414_v60 = vld [vmem:[#allocation8 + $0x30] sm:$0xff]  ;;  %v411_v63 = vld [vmem:[#allocation8 + $0x18] sm:$0xff]  ;;  %v409_v3 = vld [vmem:[#allocation8 + $0x8] sm:$0xff] }
  0x61   : > { %304 = vmatpush1.msra.mxu0 %v261_v32  ;;  %488 = vmatprep.subr.mxu1 %v423_v45  ;;  %v410_v2 = vld [vmem:[#allocation8 + $0x10] sm:$0xff]  ;;  %v408_v4 = vld [vmem:[#allocation8] sm:$0xff]  ;;  %v471_v5 = vld [vmem:[#allocation8 + $0x1f8] sm:$0xff] }
  0x62   : > { %305 = vmatprep.subr.mxu0 %v260_v34  ;;  %489 = vmatpush1.msra.mxu1 %v422_v47  ;;  %v470_v6 = vld [vmem:[#allocation8 + $0x1f0] sm:$0xff]  ;;  %v469_v7 = vld [vmem:[#allocation8 + $0x1e8] sm:$0xff]  ;;  %v468_v8 = vld [vmem:[#allocation8 + $0x1e0] sm:$0xff] }
  0x63   : > { %306 = vmatpush1.msra.mxu0 %v259_v36  ;;  %490 = vmatprep.subr.mxu1 %v421_v49  ;;  %v467_v9 = vld [vmem:[#allocation8 + $0x1d8] sm:$0xff]  ;;  %v465_v10 = vld [vmem:[#allocation8 + $0x1c8] sm:$0xff]  ;;  %v464_v11 = vld [vmem:[#allocation8 + $0x1c0] sm:$0xff] }
  0x64   : > { %307 = vmatprep.subr.mxu0 %v258_v38  ;;  %491 = vmatpush1.msra.mxu1 %v420_v51  ;;  %v463_v12 = vld [vmem:[#allocation8 + $0x1b8] sm:$0xff]  ;;  %v462_v13 = vld [vmem:[#allocation8 + $0x1b0] sm:$0xff]  ;;  %v461_v14 = vld [vmem:[#allocation8 + $0x1a8] sm:$0xff] }
  0x65   : > { %308 = vmatpush1.msra.mxu0 %v257_v40  ;;  %492 = vmatprep.subr.mxu1 %v419_v53  ;;  %v460_v15 = vld [vmem:[#allocation8 + $0x1a0] sm:$0xff]  ;;  %v459_v16 = vld [vmem:[#allocation8 + $0x198] sm:$0xff]  ;;  %v458_v17 = vld [vmem:[#allocation8 + $0x190] sm:$0xff] }
  0x66   : > { %309 = vmatprep.subr.mxu0 %v256_v42  ;;  %493 = vmatpush1.msra.mxu1 %v418_v55  ;;  %v457_v18 = vld [vmem:[#allocation8 + $0x188] sm:$0xff]  ;;  %v456_v19 = vld [vmem:[#allocation8 + $0x180] sm:$0xff]  ;;  %v455_v20 = vld [vmem:[#allocation8 + $0x178] sm:$0xff] }
  0x67   : > { %310 = vmatpush1.msra.mxu0 %v255_v44  ;;  %494 = vmatprep.subr.mxu1 %v417_v56  ;;  %v454_v21 = vld [vmem:[#allocation8 + $0x170] sm:$0xff]  ;;  %v453_v22 = vld [vmem:[#allocation8 + $0x168] sm:$0xff]  ;;  %v452_v23 = vld [vmem:[#allocation8 + $0x160] sm:$0xff] }
  0x68   : > { %311 = vmatprep.subr.mxu0 %v254_v46  ;;  %495 = vmatpush1.msra.mxu1 %v416_v57  ;;  %v451_v24 = vld [vmem:[#allocation8 + $0x158] sm:$0xff]  ;;  %v450_v25 = vld [vmem:[#allocation8 + $0x150] sm:$0xff]  ;;  %v449_v26 = vld [vmem:[#allocation8 + $0x148] sm:$0xff] }
  0x69   : > { %312 = vmatpush1.msra.mxu0 %v253_v48  ;;  %496 = vmatprep.subr.mxu1 %v415_v58  ;;  %v448_v27 = vld [vmem:[#allocation8 + $0x140] sm:$0xff]  ;;  %v447_v28 = vld [vmem:[#allocation8 + $0x138] sm:$0xff]  ;;  %v446_v29 = vld [vmem:[#allocation8 + $0x130] sm:$0xff] }
  0x6a   : > { %313 = vmatprep.subr.mxu0 %v252_v50  ;;  %497 = vmatpush1.msra.mxu1 %v414_v60  ;;  %v445_v30 = vld [vmem:[#allocation8 + $0x128] sm:$0xff]  ;;  %v444_v31 = vld [vmem:[#allocation8 + $0x120] sm:$0xff]  ;;  %v443_v32 = vld [vmem:[#allocation8 + $0x118] sm:$0xff] }
  0x6b   : > { %314 = vmatpush1.msra.mxu0 %v251_v52  ;;  %498 = vmatprep.subr.mxu1 %v413_v61  ;;  %v442_v33 = vld [vmem:[#allocation8 + $0x110] sm:$0xff]  ;;  %v441_v34 = vld [vmem:[#allocation8 + $0x108] sm:$0xff]  ;;  %v440_v35 = vld [vmem:[#allocation8 + $0x100] sm:$0xff] }
  0x6c   : > { %348 = vmatmul.mubr.f32.vlgmr.msra.gmra.mxu0 %v248_v54  ;;  %499 = vmatpush1.msra.mxu1 %v412_v62 }
  0x6d   : > { %353 = vmatprep.mubr.f32.mxu0 %v979_v0  ;;  %500 = vmatprep.subr.mxu1 %v411_v63 }
  0x6e   : > { %501 = vmatpush1.msra.mxu1 %v410_v2 }
  0x6f   : > { %502 = vmatprep.subr.mxu1 %v409_v3 }
  0x70   : > { %354 = vmatmul.mubr.f32.gmra.mxu0 %v249_v59  ;;  %503 = vmatpush1.msra.mxu1 %v408_v4 }
  0x71   : > { %359 = vmatprep.mubr.f32.mxu0 %v979_v0  ;;  %504 = vmatprep.subr.mxu1 %v471_v5  ;;  %v466_v0 = vld [vmem:[#allocation8 + $0x1d0] sm:$0xff] }
  0x72   : > { %505 = vmatpush2.msra.mxu1 %v470_v6 }
  0x73   : > { %506 = vmatprep.subr.mxu1 %v469_v7 }
  0x74   : > { %360 = vmatmul.mubr.f32.gmra.mxu0 %v250_v1  ;;  %507 = vmatpush2.msra.mxu1 %v468_v8 }
  0x75   : > { %508 = vmatprep.subr.mxu1 %v467_v9 }
  0x76   : > { %509 = vmatpush2.msra.mxu1 %v466_v0 }
  0x77   : > { %510 = vmatprep.subr.mxu1 %v465_v10 }
  0x78   : > { %511 = vmatpush2.msra.mxu1 %v464_v11 }
  0x79   : > { %512 = vmatprep.subr.mxu1 %v463_v12 }
  0x7a   : > { %513 = vmatpush2.msra.mxu1 %v462_v13 }
  0x7b   : > { %514 = vmatprep.subr.mxu1 %v461_v14 }
  0x7c   : > { %515 = vmatpush2.msra.mxu1 %v460_v15 }
  0x7d   : > { %516 = vmatprep.subr.mxu1 %v459_v16 }
  0x7e   : > { %517 = vmatpush2.msra.mxu1 %v458_v17 }
  0x7f   : > { %518 = vmatprep.subr.mxu1 %v457_v18 }
  0x80   : > { %519 = vmatpush2.msra.mxu1 %v456_v19 }
  0x81   : > { %520 = vmatprep.subr.mxu1 %v455_v20 }
  0x82   : > { %521 = vmatpush2.msra.mxu1 %v454_v21 }
  0x83   : > { %522 = vmatprep.subr.mxu1 %v453_v22 }
  0x84   : > { %523 = vmatpush2.msra.mxu1 %v452_v23 }
  0x85   : > { %524 = vmatprep.subr.mxu1 %v451_v24 }
  0x86   : > { %525 = vmatpush2.msra.mxu1 %v450_v25 }
  0x87   : > { %526 = vmatprep.subr.mxu1 %v449_v26 }
  0x88   : > { %527 = vmatpush2.msra.mxu1 %v448_v27 }
  0x89   : > { %528 = vmatprep.subr.mxu1 %v447_v28 }
  0x8a   : > { %529 = vmatpush2.msra.mxu1 %v446_v29 }
  0x8b   : > { %530 = vmatprep.subr.mxu1 %v445_v30 }
  0x8c   : > { %531 = vmatpush2.msra.mxu1 %v444_v31 }
  0x8d   : > { %532 = vmatprep.subr.mxu1 %v443_v32 }
  0x8e   : > { %533 = vmatpush2.msra.mxu1 %v442_v33 }
  0x8f   : > { %534 = vmatprep.subr.mxu1 %v441_v34 }
  0x90   : > { %535 = vmatpush2.msra.mxu1 %v440_v35 }
 0x12c   : > { %v349_v36 = vpop.f32.mrf.mxu0 }
 0x12d   : > { %v372_v37 = vmul.f32 0.70710677, %v349_v36  ;;  %v366_v54 = vmul.f32 0.5, %v349_v36 }
 0x12e   : > { %v351_v38 = vpop.f32.mrf.mxu0 }
 0x12f   : > { %794 = verf.f32 %v372_v37  ;;  %v373_v39 = vmul.f32 0.70710677, %v351_v38  ;;  %v367_v51 = vmul.f32 0.5, %v351_v38 }
 0x130   : > { %v355_v40 = vpop.f32.mrf.mxu0 }
 0x131   : > { %796 = verf.f32 %v373_v39  ;;  %v374_v41 = vmul.f32 0.70710677, %v355_v40  ;;  %v368_v62 = vmul.f32 0.5, %v355_v40 }
 0x132   : > { %v357_v42 = vpop.f32.mrf.mxu0 }
 0x133   : > { %798 = verf.f32 %v374_v41  ;;  %v375_v43 = vmul.f32 0.70710677, %v357_v42  ;;  %v369_v59 = vmul.f32 0.5, %v357_v42 }
 0x134   : > { %v361_v44 = vpop.f32.mrf.mxu0 }
 0x135   : > { %800 = verf.f32 %v375_v43  ;;  %v376_v45 = vmul.f32 0.70710677, %v361_v44  ;;  %v370_v6 = vmul.f32 0.5, %v361_v44 }
 0x136   : > { %v363_v46 = vpop.f32.mrf.mxu0 }
 0x137   : > { %802 = verf.f32 %v376_v45  ;;  %v377_v47 = vmul.f32 0.70710677, %v363_v46  ;;  %v371_v4 = vmul.f32 0.5, %v363_v46 }
 0x139   : > { %804 = verf.f32 %v377_v47 }
 0x13c   : > { %v795_v48 = vpop.eup %794 }
 0x13d   : > { %v384_v50 = vadd.f32 1.0, %v795_v48 }
 0x13e   : > { %v797_v49 = vpop.eup %796 }
 0x13f   : > { %v385_v52 = vadd.f32 1.0, %v797_v49  ;;  %v390_v57 = vmul.f32 %v384_v50, %v366_v54 }
 0x140   : > { %v799_v53 = vpop.eup %798 }
 0x141   : > { %v391_v55 = vmul.f32 %v385_v52, %v367_v51  ;;  %v386_v58 = vadd.f32 1.0, %v799_v53 }
 0x142   : > { %v801_v56 = vpop.eup %800 }
 0x143   : > { %v387_v60 = vadd.f32 1.0, %v801_v56  ;;  %536 = vmatprep.mubr.f32.mxu1 %v391_v55  ;;  %v392_v2 = vmul.f32 %v386_v58, %v368_v62 }
 0x144   : > { %v803_v61 = vpop.eup %802  ;;  %537 = vmatmul.mubr.f32.vlgmr.msra.gmra.mxu1 %v390_v57 }
 0x145   : > { %v393_v63 = vmul.f32 %v387_v60, %v369_v59  ;;  %v388_v3 = vadd.f32 1.0, %v803_v61 }
 0x146   : > { %v805_v1 = vpop.eup %804 }
 0x147   : > { %v389_v5 = vadd.f32 1.0, %v805_v1  ;;  %542 = vmatprep.mubr.f32.mxu1 %v393_v63  ;;  %v394_v8 = vmul.f32 %v388_v3, %v370_v6 }
 0x148   : > { %543 = vmatmul.mubr.f32.gmra.mxu1 %v392_v2 }
 0x149   : > { %v395_v7 = vmul.f32 %v389_v5, %v371_v4 }
 0x14b   : > { %548 = vmatprep.mubr.f32.mxu1 %v395_v7 }
 0x14c   : > { %549 = vmatmul.mubr.f32.gmra.mxu1 %v394_v8 }
 0x204   : > { %v538_v9 = vpop.f32.mrf.mxu1 }
 0x205   : > { %555 = vst [vmem:[%s239_s22] sm:$0xff] %v538_v9 }
 0x206   : > { %v540_v0 = vpop.f32.mrf.mxu1 }
 0x207   : > { %556 = vst [vmem:[%s239_s22 + $0x8] sm:$0xff] %v540_v0 }
 0x208   : > { %v544_v10 = vpop.f32.mrf.mxu1 }
 0x209   : > { %557 = vst [vmem:[%s239_s22 + $0x10] sm:$0xff] %v544_v10 }
 0x20a   : > { %v546_v11 = vpop.f32.mrf.mxu1 }
 0x20b   : > { %558 = vst [vmem:[%s239_s22 + $0x18] sm:$0xff] %v546_v11 }
 0x20c   : > { %v550_v12 = vpop.f32.mrf.mxu1 }
 0x20d   : > { %559 = vst [vmem:[%s239_s22 + $0x20] sm:$0xff] %v550_v12 }
 0x20e   : > { %v552_v13 = vpop.f32.mrf.mxu1 }
 0x20f   : > { %560 = vst [vmem:[%s239_s22 + $0x28] sm:$0xff] %v552_v13 }
 0x210   : > { %899 = shalt.err (!%p896_p5)
}
 0x211   : > { %s900_s27 = scalar_lea.hbm %s1150_s8, 768  ;;  %s904_s6 = scalar_lea.hbm %s1201_s3, 1536 }
 0x212   : > { %p901_p10 = scmp.ne.s32.totalorder %s1150_s8, %s900_s27  ;;  %p905_p6 = scmp.lt.s32.totalorder %s1150_s8, %s1201_s3 }
 0x213   : > { %p906_p12 = scmp.lt.s32.totalorder %s904_s6, %s900_s27 }
 0x214   : > { %p902_p1 = pnand %p901_p10, %p1098_p7 }
 0x215   : > { %p907_p3 = por %p906_p12, %p905_p6 }
 0x216   : > { %p903_p4 = pneg %p902_p1 }
 0x218   : > { %p908_p8 = pnand %p907_p3, %p903_p4 }
 0x21a   : > { %911 = shalt.err (!%p908_p8)
}
 0x21b   : > { %s981_s22 = smov 256   ;;  %s982_s28 = smov 16  }
 0x21c   : > { %714 = dma.vmem_to_hbm [thread:$0]  (%p1098_p7), %s1145_s24, 768, %s1150_s8, %s562_s9, %s981_s22, %s981_s22, %s982_s28  }
 0x21d PF: > { %s593_s5 = sand.u32 1, %s950_s12   ;;  %p1215_p9 = scmp.ne.s32.totalorder %s1208_s23, 0 }
 0x21e   : > { %p1216_p11 = scmp.ge.s32.totalorder %s970_s17, 2  ;;  %s594_s7 = scalar_lea.sflag [#allocation5], %s593_s5 }
 0x220   : > { %p728_p2 = pnand %p1216_p11, %p1215_p9 }
 0x222   : > { %p729_p13 = pneg %p728_p2 }
 0x224   : > { %945 = dma.done.wait (%p729_p13), %s594_s7, 768  }
 0x225   : > { %947 = vsyncadd (%p729_p13), %s594_s7, 4294966528  ;;  %s20_s17 = sadd.s32 1, %s970_s17   ;;  %s1217_s12 = smov %s954_s13 }
 0x226   : > { %p17_p0 = scmp.ge.s32.totalorder %s20_s17, 4   ;;  %s1218_s13 = smov %s958_s14 }
 0x227   : > { %s1219_s14 = smov %s1110_s29  ;;  %s1220_s15 = smov %s966_s16 }
 0x228   : > { %s1221_s16 = smov %s1223_s11  ;;  %19 = sbr.rel (!%p17_p0) target bundleno = 7 (0x7), region = 90 }
 0x22d   :  { %599 = vsyncpa [#allocation4], 1 }
 0x22e   :  { %601 = vsyncpa [#allocation4 + $0x1], 1 }
 0x22f   :  { %602 = vsyncpa [#allocation7], 1 }
 0x230   :  { %603 = vsyncpa [#allocation5], 1 }
 0x231   :  { %605 = vsyncpa [#allocation5 + $0x1], 1 }

</bundles_post_ra>
